<compile_context>
chip_gen: v7x
topology: tpu7x:2x2x1
jax: 0.10.0
libtpu: 0.0.40
codegen_flags: <defaults>
</compile_context>

<pallas_src>
import jax
import jax.numpy as jnp
from jax.experimental import pallas as pl
from jax.experimental.pallas import tpu as pltpu

GAMMA = 3.0   # focal_loss(gamma=3) — hardcoded below as an explicit cube (cheap VPU mults)
ALPHA = 0.8   # focal_loss(alpha=0.8)


def _model_loss_kernel(x_ref, mask_ref, win_ref, y_ref,
                       w1_ref, b1_ref, wqkv_ref,
                       ww_ref, bw_ref, wc1_ref, wc2_ref, bc_ref,
                       logits_ref, loss_ref):
    tb, s, d = x_ref.shape
    h_dim = w1_ref.shape[1]

    x = x_ref[...].astype(jnp.float32)        # (TB, S, D)
    m = mask_ref[...].astype(jnp.float32)     # (TB, S)
    win = win_ref[...].astype(jnp.float32)    # (TB, Dw)
    y = y_ref[...].astype(jnp.float32)        # (TB, 1)

    # --- token projection + ReLU: one flattened 2-D MXU matmul ---
    x2 = x.reshape(tb * s, d)                 # clean sublane-tile merge (S == 8)
    h2 = jnp.dot(x2, w1_ref[...], preferred_element_type=jnp.float32) + b1_ref[...]
    h2 = jnp.maximum(h2, 0.0)                 # (TB*S, H)

    # --- fused QKV projection: single (TB*S, H) x (H, 3H) matmul ---
    # 1/sqrt(H) attention scaling is pre-folded into the Q columns of wqkv.
    qkv = jnp.dot(h2, wqkv_ref[...], preferred_element_type=jnp.float32)  # (TB*S, 3H)
    q = qkv[:, 0 * h_dim:1 * h_dim].reshape(tb, s, h_dim)
    k = qkv[:, 1 * h_dim:2 * h_dim].reshape(tb, s, h_dim)
    v = qkv[:, 2 * h_dim:3 * h_dim].reshape(tb, s, h_dim)
    h3 = h2.reshape(tb, s, h_dim)             # (TB, S, H)

    # --- masked single-head self-attention ---
    scores = jnp.einsum('bqh,bkh->bqk', q, k, preferred_element_type=jnp.float32)
    key_mask = m[:, None, :]                                  # (TB, 1, S)
    scores = jnp.where(key_mask > 0.0, scores, jnp.float32(-1e30))
    smax = jnp.max(scores, axis=-1, keepdims=True)
    e = jnp.exp(scores - smax)
    # softmax denominator via approximate reciprocal on the EUP slot
    attn = e * pl.reciprocal(jnp.sum(e, axis=-1, keepdims=True), approx=True)
    a = jnp.einsum('bqk,bkh->bqh', attn, v, preferred_element_type=jnp.float32)
    hres = h3 + a                                             # residual, (TB, S, H)

    # --- masked mean pooling over the sequence axis ---
    denom = jnp.sum(m, axis=1, keepdims=True) + 1e-6          # (TB, 1)
    pooled = jnp.sum(hres * m[:, :, None], axis=1) * pl.reciprocal(denom, approx=True)

    # --- window-level feature branch ---
    w = jnp.dot(win, ww_ref[...], preferred_element_type=jnp.float32) + bw_ref[...]
    w = jnp.maximum(w, 0.0)                                   # (TB, H)

    # --- classifier head: one logit per example (scalar bias read from SMEM) ---
    logits = (jnp.sum(pooled * wc1_ref[...], axis=-1, keepdims=True)
              + jnp.sum(w * wc2_ref[...], axis=-1, keepdims=True)
              + bc_ref[0, 0])                                 # (TB, 1)
    logits_ref[...] = logits

    # --- per-example binary focal loss (gamma=3, alpha=0.8) ---
    # sigmoid via EUP reciprocal; stable softplus-style cross entropies.
    p = pl.reciprocal(1.0 + jnp.exp(-logits), approx=True)
    abs_x = jnp.abs(logits)
    # NOTE: keep log(1+exp(-|x|)) (vs log1p) — the difference only matters when
    # the CE term itself is ~1e-7, i.e. negligible in the mean loss, and it
    # avoids relying on a log1p lowering in Mosaic.
    log_term = jnp.log(1.0 + jnp.exp(-abs_x))
    ce_pos = jnp.maximum(-logits, 0.0) + log_term             # -log(sigmoid(x))
    ce_neg = jnp.maximum(logits, 0.0) + log_term              # -log(1 - sigmoid(x))
    one_m_p = 1.0 - p
    loss_i = (ALPHA * y * one_m_p * one_m_p * one_m_p * ce_pos
              + (1.0 - ALPHA) * (1.0 - y) * p * p * p * ce_neg)
    loss_ref[...] = loss_i                                    # (TB, 1) per-example


def model_with_loss(x, mask, win, y, params, *, tile_b=None):
    """Returns (outputs, labels, {'loss': loss}) like the PyTorch module."""
    B, S, D = x.shape
    DW = win.shape[1]
    H = params['w1'].shape[1]

    # Batch tile.  Default: whole batch in one grid step (toy sizes).  For
    # large deployments set tile_b to a multiple of 8 so the batch axis is
    # pipelined and shared across TensorCores (v7x) / megacore.
    if tile_b is None:
        tile_b = B
    assert B % tile_b == 0, "batch must be divisible by the batch tile"
    TB = tile_b

    # Fuse Q/K/V weights into one (H, 3H) matrix and fold in the 1/sqrt(H)
    # attention scale (constant-folded under jit; done once, outside kernel).
    inv_sqrt_h = 1.0 / jnp.sqrt(jnp.float32(H))
    wqkv = jnp.concatenate(
        [params['wq'] * inv_sqrt_h, params['wk'], params['wv']], axis=1)

    batch_map2 = lambda i: (i, 0)
    batch_map3 = lambda i: (i, 0, 0)
    const2 = lambda i: (0, 0)

    in_specs = [
        pl.BlockSpec((TB, S, D), batch_map3),     # x
        pl.BlockSpec((TB, S), batch_map2),        # mask
        pl.BlockSpec((TB, DW), batch_map2),       # win features
        pl.BlockSpec((TB, 1), batch_map2),        # labels
        pl.BlockSpec((D, H), const2),             # w1
        pl.BlockSpec((1, H), const2),             # b1
        pl.BlockSpec((H, 3 * H), const2),         # fused wqkv
        pl.BlockSpec((DW, H), const2),            # ww
        pl.BlockSpec((1, H), const2),             # bw
        pl.BlockSpec((1, H), const2),             # wc1
        pl.BlockSpec((1, H), const2),             # wc2
        pl.BlockSpec(memory_space=pltpu.MemorySpace.SMEM),   # bc scalar in SMEM
    ]
    # TODO(synk): for very large B, emit logits lane-dense (e.g. (1, TB) per
    # step) to avoid masked partial stores; at (TB, 1) toy sizes it is moot.
    out_specs = (
        pl.BlockSpec((TB, 1), batch_map2),        # logits
        pl.BlockSpec((TB, 1), batch_map2),        # per-example focal loss
    )

    logits, loss_pe = pl.pallas_call(
        _model_loss_kernel,
        grid=(B // TB,),
        in_specs=in_specs,
        out_specs=out_specs,
        out_shape=(jax.ShapeDtypeStruct((B, 1), jnp.float32),
                   jax.ShapeDtypeStruct((B, 1), jnp.float32)),
        compiler_params=pltpu.CompilerParams(
            dimension_semantics=("parallel",)),
    )(x, mask, win, y,
      params['w1'], params['b1'], wqkv,
      params['ww'], params['bw'], params['wc1'], params['wc2'], params['bc'])

    loss = jnp.mean(loss_pe)   # reduction='mean' of the focal loss
    return logits, y, {'loss': loss}


def _reference(x, mask, win, y, p):
    """Pure-JAX reference with identical semantics (sanity check)."""
    h = jnp.maximum(jnp.einsum('bsd,dh->bsh', x, p['w1']) + p['b1'], 0.0)
    q = jnp.einsum('bsh,hk->bsk', h, p['wq'])
    k = jnp.einsum('bsh,hk->bsk', h, p['wk'])
    v = jnp.einsum('bsh,hk->bsk', h, p['wv'])
    s = jnp.einsum('bqh,bkh->bqk', q, k) / jnp.sqrt(jnp.float32(q.shape[-1]))
    s = jnp.where(mask[:, None, :] > 0.0, s, -1e30)
    attn = jax.nn.softmax(s, axis=-1)
    h2 = h + jnp.einsum('bqk,bkh->bqh', attn, v)
    pooled = jnp.sum(h2 * mask[:, :, None], axis=1) / (
        jnp.sum(mask, axis=1, keepdims=True) + 1e-6)
    w = jnp.maximum(jnp.dot(win, p['ww']) + p['bw'], 0.0)
    logits = (jnp.sum(pooled * p['wc1'], -1, keepdims=True)
              + jnp.sum(w * p['wc2'], -1, keepdims=True) + p['bc'][0, 0])
    prob = jax.nn.sigmoid(logits)
    ce_pos = jax.nn.softplus(-logits)
    ce_neg = jax.nn.softplus(logits)
    loss_i = (ALPHA * y * (1 - prob) ** 3 * ce_pos
              + (1 - ALPHA) * (1 - y) * prob ** 3 * ce_neg)
    return logits, jnp.mean(loss_i)


if __name__ == "__main__":
    B, S, D, DW, H = 2, 8, 32, 16, 32

    key = jax.random.PRNGKey(0)
    ks = jax.random.split(key, 12)

    x = jax.random.normal(ks[0], (B, S, D), dtype=jnp.float32)
    win = jax.random.normal(ks[1], (B, DW), dtype=jnp.float32)
    labels = jax.random.bernoulli(ks[2], 0.5, (B, 1)).astype(jnp.float32)
    mask = jnp.ones((B, S), dtype=jnp.float32)
    mask = mask.at[1, 6:].set(0.0)  # pad the tail of the second example

    sc = 0.1
    params = {
        'w1':  sc * jax.random.normal(ks[3], (D, H), dtype=jnp.float32),
        'b1':  jnp.zeros((1, H), dtype=jnp.float32),
        'wq':  sc * jax.random.normal(ks[4], (H, H), dtype=jnp.float32),
        'wk':  sc * jax.random.normal(ks[5], (H, H), dtype=jnp.float32),
        'wv':  sc * jax.random.normal(ks[6], (H, H), dtype=jnp.float32),
        'ww':  sc * jax.random.normal(ks[7], (DW, H), dtype=jnp.float32),
        'bw':  jnp.zeros((1, H), dtype=jnp.float32),
        'wc1': sc * jax.random.normal(ks[8], (1, H), dtype=jnp.float32),
        'wc2': sc * jax.random.normal(ks[9], (1, H), dtype=jnp.float32),
        'bc':  jnp.zeros((1, 1), dtype=jnp.float32),
    }

    run = jax.jit(model_with_loss)
    outputs, labels_out, loss_stats = run(x, mask, win, labels, params)
    jax.block_until_ready((outputs, labels_out, loss_stats['loss']))

    ref_logits, ref_loss = _reference(x, mask, win, labels, params)
    # Slightly looser tolerance: approximate EUP reciprocals (softmax denom,
    # pooled denom, sigmoid) introduce ~1e-4 relative error vs the exact ref.
    assert jnp.allclose(outputs, ref_logits, rtol=5e-3, atol=5e-3)
    assert jnp.allclose(loss_stats['loss'], ref_loss, rtol=5e-3, atol=5e-3)

    print("KERNEL_OK")
</pallas_src>

<mosaic_0001>
module attributes {stable_mosaic.version = 11 : i64} {
  func.func @_model_loss_kernel(%arg0: i32, %arg1: memref<2x8x32xf32, #tpu.memory_space<vmem>>, %arg2: memref<2x8xf32, #tpu.memory_space<vmem>>, %arg3: memref<2x16xf32, #tpu.memory_space<vmem>>, %arg4: memref<2x1xf32, #tpu.memory_space<vmem>>, %arg5: memref<32x32xf32, #tpu.memory_space<vmem>>, %arg6: memref<1x32xf32, #tpu.memory_space<vmem>>, %arg7: memref<32x96xf32, #tpu.memory_space<vmem>>, %arg8: memref<16x32xf32, #tpu.memory_space<vmem>>, %arg9: memref<1x32xf32, #tpu.memory_space<vmem>>, %arg10: memref<1x32xf32, #tpu.memory_space<vmem>>, %arg11: memref<1x32xf32, #tpu.memory_space<vmem>>, %arg12: memref<1x1xf32, #tpu.memory_space<smem>>, %arg13: memref<2x1xf32, #tpu.memory_space<vmem>>, %arg14: memref<2x1xf32, #tpu.memory_space<vmem>>) attributes {dimension_semantics = [#tpu.dimension_semantics<parallel>], iteration_bounds = array<i64: 1>, scalar_prefetch = 0 : i64, scratch_operands = 0 : i64, tpu.core_type = #tpu.core_type<tc>, window_params = [{transform_indices = @transform_0, window_bounds = array<i64: 2, 8, 32>}, {transform_indices = @transform_1, window_bounds = array<i64: 2, 8>}, {transform_indices = @transform_2, window_bounds = array<i64: 2, 16>}, {transform_indices = @transform_3, window_bounds = array<i64: 2, 1>}, {pipeline_mode = #tpu.pipeline_mode<synchronous>, transform_indices = @transform_4, window_bounds = array<i64: 32, 32>}, {pipeline_mode = #tpu.pipeline_mode<synchronous>, transform_indices = @transform_5, window_bounds = array<i64: 1, 32>}, {pipeline_mode = #tpu.pipeline_mode<synchronous>, transform_indices = @transform_6, window_bounds = array<i64: 32, 96>}, {pipeline_mode = #tpu.pipeline_mode<synchronous>, transform_indices = @transform_7, window_bounds = array<i64: 16, 32>}, {pipeline_mode = #tpu.pipeline_mode<synchronous>, transform_indices = @transform_8, window_bounds = array<i64: 1, 32>}, {pipeline_mode = #tpu.pipeline_mode<synchronous>, transform_indices = @transform_9, window_bounds = array<i64: 1, 32>}, {pipeline_mode = #tpu.pipeline_mode<synchronous>, transform_indices = @transform_10, window_bounds = array<i64: 1, 32>}, {transform_indices = @transform_11, window_bounds = array<i64: 1, 1>}, {transform_indices = @transform_12, window_bounds = array<i64: 2, 1>}, {transform_indices = @transform_13, window_bounds = array<i64: 2, 1>}]} {
    %c0 = arith.constant 0 : index
    %c0_0 = arith.constant 0 : index
    %c0_1 = arith.constant 0 : index
    %0 = vector.load %arg1[%c0, %c0_0, %c0_1] : memref<2x8x32xf32, #tpu.memory_space<vmem>>, vector<2x8x32xf32>
    %c0_2 = arith.constant 0 : index
    %c0_3 = arith.constant 0 : index
    %1 = vector.load %arg2[%c0_2, %c0_3] : memref<2x8xf32, #tpu.memory_space<vmem>>, vector<2x8xf32>
    %c0_4 = arith.constant 0 : index
    %c0_5 = arith.constant 0 : index
    %2 = vector.load %arg3[%c0_4, %c0_5] : memref<2x16xf32, #tpu.memory_space<vmem>>, vector<2x16xf32>
    %c0_6 = arith.constant 0 : index
    %c0_7 = arith.constant 0 : index
    %3 = vector.load %arg4[%c0_6, %c0_7] : memref<2x1xf32, #tpu.memory_space<vmem>>, vector<2x1xf32>
    %4 = vector.shape_cast %0 : vector<2x8x32xf32> to vector<16x32xf32>
    %c0_8 = arith.constant 0 : index
    %c0_9 = arith.constant 0 : index
    %5 = vector.load %arg5[%c0_8, %c0_9] : memref<32x32xf32, #tpu.memory_space<vmem>>, vector<32x32xf32>
    %cst = arith.constant dense<0.000000e+00> : vector<16x32xf32>
    %6 = tpu.matmul %4, %5, %cst {dimension_numbers = #tpu.dot_dimension_numbers<[1], [0], [0], [1], [0, 0, 1, 1], [], []>} : vector<16x32xf32>, vector<32x32xf32>, vector<16x32xf32> -> vector<16x32xf32>
    %c0_10 = arith.constant 0 : index
    %c0_11 = arith.constant 0 : index
    %7 = vector.load %arg6[%c0_10, %c0_11] : memref<1x32xf32, #tpu.memory_space<vmem>>, vector<1x32xf32>
    %8 = vector.broadcast %7 : vector<1x32xf32> to vector<16x32xf32>
    %9 = arith.addf %6, %8 : vector<16x32xf32>
    %cst_12 = arith.constant 0.000000e+00 : f32
    %10 = vector.broadcast %cst_12 : f32 to vector<16x32xf32>
    %11 = arith.maximumf %9, %10 : vector<16x32xf32>
    %c0_13 = arith.constant 0 : index
    %c0_14 = arith.constant 0 : index
    %12 = vector.load %arg7[%c0_13, %c0_14] : memref<32x96xf32, #tpu.memory_space<vmem>>, vector<32x96xf32>
    %cst_15 = arith.constant dense<0.000000e+00> : vector<16x96xf32>
    %13 = tpu.matmul %11, %12, %cst_15 {dimension_numbers = #tpu.dot_dimension_numbers<[1], [0], [0], [1], [0, 0, 1, 1], [], []>} : vector<16x32xf32>, vector<32x96xf32>, vector<16x96xf32> -> vector<16x96xf32>
    %14 = vector.extract_strided_slice %13 {offsets = [0, 0], sizes = [16, 32], strides = [1, 1]} : vector<16x96xf32> to vector<16x32xf32>
    %15 = vector.shape_cast %14 : vector<16x32xf32> to vector<2x8x32xf32>
    %16 = vector.extract_strided_slice %13 {offsets = [0, 32], sizes = [16, 32], strides = [1, 1]} : vector<16x96xf32> to vector<16x32xf32>
    %17 = vector.shape_cast %16 : vector<16x32xf32> to vector<2x8x32xf32>
    %18 = vector.extract_strided_slice %13 {offsets = [0, 64], sizes = [16, 32], strides = [1, 1]} : vector<16x96xf32> to vector<16x32xf32>
    %19 = vector.shape_cast %18 : vector<16x32xf32> to vector<2x8x32xf32>
    %20 = vector.shape_cast %11 : vector<16x32xf32> to vector<2x8x32xf32>
    "tpu.trace_start"() <{level = 10 : i32, message = "bqh,bkh->bqk"}> : () -> ()
    %cst_16 = arith.constant dense<0.000000e+00> : vector<2x8x8xf32>
    %21 = tpu.matmul %15, %17, %cst_16 {dimension_numbers = #tpu.dot_dimension_numbers<[2], [2], [1], [1], [0, 0, 0, 1, 1, 1], [0], [0]>} : vector<2x8x32xf32>, vector<2x8x32xf32>, vector<2x8x8xf32> -> vector<2x8x8xf32>
    "tpu.trace_stop"() : () -> ()
    %22 = vector.shape_cast %1 : vector<2x8xf32> to vector<2x1x8xf32>
    %cst_17 = arith.constant 0.000000e+00 : f32
    %23 = vector.broadcast %cst_17 : f32 to vector<2x1x8xf32>
    %24 = arith.cmpf ogt, %22, %23 : vector<2x1x8xf32>
    %cst_18 = arith.constant -1.000000e+30 : f32
    %25 = vector.shape_cast %24 : vector<2x1x8xi1> to vector<2x1x8xi1>
    %26 = vector.broadcast %25 : vector<2x1x8xi1> to vector<2x8x8xi1>
    %27 = vector.broadcast %cst_18 : f32 to vector<2x8x8xf32>
    %28 = arith.select %26, %21, %27 : vector<2x8x8xi1>, vector<2x8x8xf32>
    %cst_19 = arith.constant dense<0xFF800000> : vector<2x8xf32>
    %29 = vector.multi_reduction <maximumf>, %28, %cst_19 [2] : vector<2x8x8xf32> to vector<2x8xf32>
    %30 = vector.shape_cast %29 : vector<2x8xf32> to vector<2x8x1xf32>
    %31 = vector.broadcast %30 : vector<2x8x1xf32> to vector<2x8x8xf32>
    %32 = arith.subf %28, %31 : vector<2x8x8xf32>
    %33 = math.exp %32 : vector<2x8x8xf32>
    %cst_20 = arith.constant dense<0.000000e+00> : vector<2x8xf32>
    %34 = vector.multi_reduction <add>, %33, %cst_20 [2] : vector<2x8x8xf32> to vector<2x8xf32>
    %35 = vector.shape_cast %34 : vector<2x8xf32> to vector<2x8x1xf32>
    %36 = tpu.reciprocal %35 {approx = true} : vector<2x8x1xf32> -> vector<2x8x1xf32>
    %37 = vector.broadcast %36 : vector<2x8x1xf32> to vector<2x8x8xf32>
    %38 = arith.mulf %33, %37 : vector<2x8x8xf32>
    "tpu.trace_start"() <{level = 10 : i32, message = "bqk,bkh->bqh"}> : () -> ()
    %cst_21 = arith.constant dense<0.000000e+00> : vector<2x8x32xf32>
    %39 = tpu.matmul %38, %19, %cst_21 {dimension_numbers = #tpu.dot_dimension_numbers<[2], [1], [1], [2], [0, 0, 0, 1, 1, 2], [0], [0]>} : vector<2x8x8xf32>, vector<2x8x32xf32>, vector<2x8x32xf32> -> vector<2x8x32xf32>
    "tpu.trace_stop"() : () -> ()
    %40 = arith.addf %20, %39 : vector<2x8x32xf32>
    %cst_22 = arith.constant dense<0.000000e+00> : vector<2xf32>
    %41 = vector.multi_reduction <add>, %1, %cst_22 [1] : vector<2x8xf32> to vector<2xf32>
    %42 = vector.shape_cast %41 : vector<2xf32> to vector<2x1xf32>
    %cst_23 = arith.constant 9.99999997E-7 : f32
    %43 = vector.broadcast %cst_23 : f32 to vector<2x1xf32>
    %44 = arith.addf %42, %43 : vector<2x1xf32>
    %45 = vector.shape_cast %1 : vector<2x8xf32> to vector<2x8x1xf32>
    %46 = vector.broadcast %45 : vector<2x8x1xf32> to vector<2x8x32xf32>
    %47 = arith.mulf %40, %46 : vector<2x8x32xf32>
    %cst_24 = arith.constant dense<0.000000e+00> : vector<2x32xf32>
    %48 = vector.multi_reduction <add>, %47, %cst_24 [1] : vector<2x8x32xf32> to vector<2x32xf32>
    %49 = tpu.reciprocal %44 {approx = true} : vector<2x1xf32> -> vector<2x1xf32>
    %50 = vector.broadcast %49 : vector<2x1xf32> to vector<2x32xf32>
    %51 = arith.mulf %48, %50 : vector<2x32xf32>
    %c0_25 = arith.constant 0 : index
    %c0_26 = arith.constant 0 : index
    %52 = vector.load %arg8[%c0_25, %c0_26] : memref<16x32xf32, #tpu.memory_space<vmem>>, vector<16x32xf32>
    %cst_27 = arith.constant dense<0.000000e+00> : vector<2x32xf32>
    %53 = tpu.matmul %2, %52, %cst_27 {dimension_numbers = #tpu.dot_dimension_numbers<[1], [0], [0], [1], [0, 0, 1, 1], [], []>} : vector<2x16xf32>, vector<16x32xf32>, vector<2x32xf32> -> vector<2x32xf32>
    %c0_28 = arith.constant 0 : index
    %c0_29 = arith.constant 0 : index
    %54 = vector.load %arg9[%c0_28, %c0_29] : memref<1x32xf32, #tpu.memory_space<vmem>>, vector<1x32xf32>
    %55 = vector.broadcast %54 : vector<1x32xf32> to vector<2x32xf32>
    %56 = arith.addf %53, %55 : vector<2x32xf32>
    %cst_30 = arith.constant 0.000000e+00 : f32
    %57 = vector.broadcast %cst_30 : f32 to vector<2x32xf32>
    %58 = arith.maximumf %56, %57 : vector<2x32xf32>
    %c0_31 = arith.constant 0 : index
    %c0_32 = arith.constant 0 : index
    %59 = vector.load %arg10[%c0_31, %c0_32] : memref<1x32xf32, #tpu.memory_space<vmem>>, vector<1x32xf32>
    %60 = vector.broadcast %59 : vector<1x32xf32> to vector<2x32xf32>
    %61 = arith.mulf %51, %60 : vector<2x32xf32>
    %cst_33 = arith.constant dense<0.000000e+00> : vector<2xf32>
    %62 = vector.multi_reduction <add>, %61, %cst_33 [1] : vector<2x32xf32> to vector<2xf32>
    %63 = vector.shape_cast %62 : vector<2xf32> to vector<2x1xf32>
    %c0_34 = arith.constant 0 : index
    %c0_35 = arith.constant 0 : index
    %64 = vector.load %arg11[%c0_34, %c0_35] : memref<1x32xf32, #tpu.memory_space<vmem>>, vector<1x32xf32>
    %65 = vector.broadcast %64 : vector<1x32xf32> to vector<2x32xf32>
    %66 = arith.mulf %58, %65 : vector<2x32xf32>
    %cst_36 = arith.constant dense<0.000000e+00> : vector<2xf32>
    %67 = vector.multi_reduction <add>, %66, %cst_36 [1] : vector<2x32xf32> to vector<2xf32>
    %68 = vector.shape_cast %67 : vector<2xf32> to vector<2x1xf32>
    %69 = arith.addf %63, %68 : vector<2x1xf32>
    %c0_37 = arith.constant 0 : index
    %c0_38 = arith.constant 0 : index
    %70 = memref.load %arg12[%c0_37, %c0_38] : memref<1x1xf32, #tpu.memory_space<smem>>
    %71 = vector.broadcast %70 : f32 to vector<2x1xf32>
    %72 = arith.addf %69, %71 : vector<2x1xf32>
    %c0_39 = arith.constant 0 : index
    %c0_40 = arith.constant 0 : index
    %73 = vector.load %arg13[%c0_39, %c0_40] : memref<2x1xf32, #tpu.memory_space<vmem>>, vector<2x1xf32>
    tpu.vector_store %arg13[%c0_39, %c0_40], %72 {strides = array<i32>} : memref<2x1xf32, #tpu.memory_space<vmem>>, vector<2x1xf32>,
    %cst_41 = arith.constant 0.000000e+00 : f32
    %74 = vector.broadcast %cst_41 : f32 to vector<2x1xf32>
    %75 = arith.subf %74, %72 : vector<2x1xf32>
    %76 = math.exp %75 : vector<2x1xf32>
    %cst_42 = arith.constant 1.000000e+00 : f32
    %77 = vector.broadcast %cst_42 : f32 to vector<2x1xf32>
    %78 = arith.addf %77, %76 : vector<2x1xf32>
    %79 = tpu.reciprocal %78 {approx = true} : vector<2x1xf32> -> vector<2x1xf32>
    %80 = math.absf %72 : vector<2x1xf32>
    %cst_43 = arith.constant 0.000000e+00 : f32
    %81 = vector.broadcast %cst_43 : f32 to vector<2x1xf32>
    %82 = arith.subf %81, %80 : vector<2x1xf32>
    %83 = math.exp %82 : vector<2x1xf32>
    %cst_44 = arith.constant 1.000000e+00 : f32
    %84 = vector.broadcast %cst_44 : f32 to vector<2x1xf32>
    %85 = arith.addf %84, %83 : vector<2x1xf32>
    %86 = math.log %85 : vector<2x1xf32>
    %cst_45 = arith.constant 0.000000e+00 : f32
    %87 = vector.broadcast %cst_45 : f32 to vector<2x1xf32>
    %88 = arith.subf %87, %72 : vector<2x1xf32>
    %cst_46 = arith.constant 0.000000e+00 : f32
    %89 = vector.broadcast %cst_46 : f32 to vector<2x1xf32>
    %90 = arith.maximumf %88, %89 : vector<2x1xf32>
    %91 = arith.addf %90, %86 : vector<2x1xf32>
    %cst_47 = arith.constant 0.000000e+00 : f32
    %92 = vector.broadcast %cst_47 : f32 to vector<2x1xf32>
    %93 = arith.maximumf %72, %92 : vector<2x1xf32>
    %94 = arith.addf %93, %86 : vector<2x1xf32>
    %cst_48 = arith.constant 1.000000e+00 : f32
    %95 = vector.broadcast %cst_48 : f32 to vector<2x1xf32>
    %96 = arith.subf %95, %79 : vector<2x1xf32>
    %cst_49 = arith.constant 8.000000e-01 : f32
    %97 = vector.broadcast %cst_49 : f32 to vector<2x1xf32>
    %98 = arith.mulf %97, %3 : vector<2x1xf32>
    %99 = arith.mulf %98, %96 : vector<2x1xf32>
    %100 = arith.mulf %99, %96 : vector<2x1xf32>
    %101 = arith.mulf %100, %96 : vector<2x1xf32>
    %102 = arith.mulf %101, %91 : vector<2x1xf32>
    %cst_50 = arith.constant 1.000000e+00 : f32
    %103 = vector.broadcast %cst_50 : f32 to vector<2x1xf32>
    %104 = arith.subf %103, %3 : vector<2x1xf32>
    %cst_51 = arith.constant 2.000000e-01 : f32
    %105 = vector.broadcast %cst_51 : f32 to vector<2x1xf32>
    %106 = arith.mulf %105, %104 : vector<2x1xf32>
    %107 = arith.mulf %106, %79 : vector<2x1xf32>
    %108 = arith.mulf %107, %79 : vector<2x1xf32>
    %109 = arith.mulf %108, %79 : vector<2x1xf32>
    %110 = arith.mulf %109, %94 : vector<2x1xf32>
    %111 = arith.addf %102, %110 : vector<2x1xf32>
    %c0_52 = arith.constant 0 : index
    %c0_53 = arith.constant 0 : index
    %112 = vector.load %arg14[%c0_52, %c0_53] : memref<2x1xf32, #tpu.memory_space<vmem>>, vector<2x1xf32>
    tpu.vector_store %arg14[%c0_52, %c0_53], %111 {strides = array<i32>} : memref<2x1xf32, #tpu.memory_space<vmem>>, vector<2x1xf32>,
    return
  }
  func.func @transform_0(%arg0: i32) -> (i32, i32, i32) {
    %c0_i32 = arith.constant 0 : i32
    %c0_i32_0 = arith.constant 0 : i32
    %c0_i32_1 = arith.constant 0 : i32
    return %arg0, %c0_i32, %c0_i32_0 : i32, i32, i32
  }
  func.func @transform_1(%arg0: i32) -> (i32, i32) {
    %c0_i32 = arith.constant 0 : i32
    %c0_i32_0 = arith.constant 0 : i32
    return %arg0, %c0_i32 : i32, i32
  }
  func.func @transform_2(%arg0: i32) -> (i32, i32) {
    %c0_i32 = arith.constant 0 : i32
    %c0_i32_0 = arith.constant 0 : i32
    return %arg0, %c0_i32 : i32, i32
  }
  func.func @transform_3(%arg0: i32) -> (i32, i32) {
    %c0_i32 = arith.constant 0 : i32
    %c0_i32_0 = arith.constant 0 : i32
    return %arg0, %c0_i32 : i32, i32
  }
  func.func @transform_4(%arg0: i32) -> (i32, i32) {
    %c0_i32 = arith.constant 0 : i32
    %c0_i32_0 = arith.constant 0 : i32
    %c0_i32_1 = arith.constant 0 : i32
    return %c0_i32, %c0_i32_0 : i32, i32
  }
  func.func @transform_5(%arg0: i32) -> (i32, i32) {
    %c0_i32 = arith.constant 0 : i32
    %c0_i32_0 = arith.constant 0 : i32
    %c0_i32_1 = arith.constant 0 : i32
    return %c0_i32, %c0_i32_0 : i32, i32
  }
  func.func @transform_6(%arg0: i32) -> (i32, i32) {
    %c0_i32 = arith.constant 0 : i32
    %c0_i32_0 = arith.constant 0 : i32
    %c0_i32_1 = arith.constant 0 : i32
    return %c0_i32, %c0_i32_0 : i32, i32
  }
  func.func @transform_7(%arg0: i32) -> (i32, i32) {
    %c0_i32 = arith.constant 0 : i32
    %c0_i32_0 = arith.constant 0 : i32
    %c0_i32_1 = arith.constant 0 : i32
    return %c0_i32, %c0_i32_0 : i32, i32
  }
  func.func @transform_8(%arg0: i32) -> (i32, i32) {
    %c0_i32 = arith.constant 0 : i32
    %c0_i32_0 = arith.constant 0 : i32
    %c0_i32_1 = arith.constant 0 : i32
    return %c0_i32, %c0_i32_0 : i32, i32
  }
  func.func @transform_9(%arg0: i32) -> (i32, i32) {
    %c0_i32 = arith.constant 0 : i32
    %c0_i32_0 = arith.constant 0 : i32
    %c0_i32_1 = arith.constant 0 : i32
    return %c0_i32, %c0_i32_0 : i32, i32
  }
  func.func @transform_10(%arg0: i32) -> (i32, i32) {
    %c0_i32 = arith.constant 0 : i32
    %c0_i32_0 = arith.constant 0 : i32
    %c0_i32_1 = arith.constant 0 : i32
    return %c0_i32, %c0_i32_0 : i32, i32
  }
  func.func @transform_11(%arg0: i32) -> (i32, i32) {
    %c0_i32 = arith.constant 0 : i32
    %c0_i32_0 = arith.constant 0 : i32
    %c0_i32_1 = arith.constant 0 : i32
    return %c0_i32, %c0_i32_0 : i32, i32
  }
  func.func @transform_12(%arg0: i32) -> (i32, i32) {
    %c0_i32 = arith.constant 0 : i32
    %c0_i32_0 = arith.constant 0 : i32
    return %arg0, %c0_i32 : i32, i32
  }
  func.func @transform_13(%arg0: i32) -> (i32, i32) {
    %c0_i32 = arith.constant 0 : i32
    %c0_i32_0 = arith.constant 0 : i32
    return %arg0, %c0_i32 : i32, i32
  }
}

</mosaic_0001>

<bundles_post_ra>
// kernel: model_with_loss.1
= control target key start
LH: loop header
LB: loop body
LE: loop exit
PB: predicated region body
PF: predicated region fallthrough
CT: control target
= control target key end

     0   :  { %vm60_vm0 = vcmask 261120   ;;  %v932_v21 = vmov 0.0   ;;  %vm933_vm1 = vmmov 0   ;;  %v935_v26 = vmov 1966171168   ;;  %s1123_s4 = inlined_call_operand.vmem [shape: f32[32,32], index: 4, kind: input, shape index: {}]   ;;  %s1124_s0 = inlined_call_operand.vmem [shape: f32[2,8,32], index: 0, kind: input, shape index: {}]   ;;  %s1125_s6 = inlined_call_operand.vmem [shape: f32[32,96], index: 6, kind: input, shape index: {}]   ;;  %s1126_s5 = inlined_call_operand.vmem [shape: f32[1,32], index: 5, kind: input, shape index: {}]   ;;  %s1127_s1 = inlined_call_operand.vmem [shape: f32[2,8], index: 1, kind: input, shape index: {}]   ;;  %s1128_s7 = inlined_call_operand.vmem [shape: f32[16,32], index: 7, kind: input, shape index: {}]   ;;  %s1129_s2 = inlined_call_operand.vmem [shape: f32[2,16], index: 2, kind: input, shape index: {}]   ;;  %s1130_s8 = inlined_call_operand.vmem [shape: f32[1,32], index: 8, kind: input, shape index: {}]   ;;  %s1131_s10 = inlined_call_operand.vmem [shape: f32[1,32], index: 10, kind: input, shape index: {}]   ;;  %s1132_s9 = inlined_call_operand.vmem [shape: f32[1,32], index: 9, kind: input, shape index: {}]   ;;  %s1133_s11 = inlined_call_operand.<no memory space> [shape: f32[1,1], index: 11, kind: input, shape index: {}]   ;;  %s1134_s12 = inlined_call_operand.vmem [shape: f32[2,1], index: 12, kind: output, shape index: {0}]   ;;  %s1135_s3 = inlined_call_operand.vmem [shape: f32[2,1], index: 3, kind: input, shape index: {}]   ;;  %s1136_s13 = inlined_call_operand.vmem [shape: f32[2,1], index: 13, kind: output, shape index: {1}]  }
   0x1   :  { %v49_v0 = vld [vmem:[%s1123_s4] sm:$0xff]  ;;  %v50_v1 = vld [vmem:[%s1123_s4 + $0x8] sm:$0xff]  ;;  %v51_v2 = vld [vmem:[%s1123_s4 + $0x10] sm:$0xff]  ;;  %v385_v27 = vunpack.c.l.s4 %v935_v26  ;;  %v387_v28 = vlaneseq  ;;  %v936_v38 = vmov 0   ;;  %vm424_vm5 = vcmask 64512  }
   0x2   :  { %v888_v3 = vpack.c.bf16 %v50_v1, %v49_v0  ;;  %v52_v4 = vld [vmem:[%s1123_s4 + $0x18] sm:$0xff]  ;;  %v44_v5 = vld [vmem:[%s1124_s0] sm:$0xff]  ;;  %v145_v8 = vld [vmem:[%s1125_s6 + $0x8] sm:$0xff]  ;;  %vm601_vm7 = vcmask 58368   ;;  %vm652_vm8 = vcmask 130048   ;;  %vm742_vm9 = vcmask 254976  }
   0x3   :  { %v892_v6 = vpack.c.bf16 %v52_v4, %v51_v2  ;;  %847 = vmatprep.mubr.msk.f32.mxu0 %vm60_vm0, %v44_v5  ;;  %v144_v7 = vld [vmem:[%s1125_s6] sm:$0xff]  ;;  %v45_v10 = vld [vmem:[%s1124_s0 + $0x8] sm:$0xff]  ;;  %v146_v11 = vld [vmem:[%s1125_s6 + $0x10] sm:$0xff]  ;;  %s934_s0 = smov 96   ;;  %v386_v29 = vunpack.c.0.s8 %v385_v27  ;;  %v388_v30 = vshrl.u32 %v387_v28, 7  ;;  %v938_v5 = vmov 0.0|0.0  }
   0x4   :  { %889 = vmatprep.subr.bf16.mxu0 %v888_v3  ;;  %v896_v9 = vpack.c.bf16 %v145_v8, %v144_v7  ;;  %v147_v12 = vld [vmem:[%s1125_s6 + $0x18] sm:$0xff]  ;;  %v801_v14 = vld [vmem:[%s1126_s5] ss:$0 sm:$0xff]  ;;  %vm739_vm10 = vcmask 1041409   ;;  %vm761_vm11 = vcmask 1024  }
   0x5   :  { %891 = vmatpush3.bf16.msra.mxu0 %v888_v3  ;;  %v900_v13 = vpack.c.bf16 %v147_v12, %v146_v11  ;;  %v389_v31 = vsub.s32 %v386_v29, %v388_v30  ;;  %v46_v32 = vld [vmem:[%s1127_s1] sm:$0x3]  ;;  %v414_v37 = vsub.s32 0, %v388_v30  ;;  %s937_s1 = smov 64   ;;  %v615_v62 = vsub.s32 1, %v388_v30 }
   0x6   :  { %893 = vmatprep.subr.bf16.mxu0 %v892_v6  ;;  %897 = vmatprep.subr.bf16.mxu1 %v896_v9  ;;  %v602_v1 = vsel %vm601_vm7, %v46_v32, 0.0  ;;  %v643_v8 = vld [vmem:[%s1128_s7] sm:$0xff] }
   0x7   :  { %899 = vmatpush3.bf16.msra.mxu1 %v896_v9  ;;  %v390_v33 = vrot.slane %v46_v32, %v389_v31  ;;  %v616_v63 = vrot.slane %v46_v32, %v615_v62  ;;  %v609_v0 = vrot.slane %v46_v32, %v414_v37  ;;  %v644_v9 = vld [vmem:[%s1128_s7 + $0x8] sm:$0xff] }
   0x8   :  { %901 = vmatprep.subr.bf16.mxu1 %v900_v13  ;;  %v905_v11 = vpack.c.bf16 %v644_v9, %v643_v8 }
   0x9   :  { %895 = vmatpush3.bf16.msra.mxu0 %v892_v6  ;;  %v391_v34 = vcombine.high %v390_v33, %v390_v33  ;;  %v398_v36 = vrot.slane %v390_v33, %v389_v31 }
   0xa   :  { %861 = vmatprep.subr.mxu0 %v932_v21 }
   0xb   :  { %903 = vmatpush3.bf16.msra.mxu1 %v900_v13  ;;  %v405_v35 = vrot.slane %v391_v34, %v389_v31  ;;  %vm408_vm3 = vcmp.gt.f32.partialorder %v398_v36, 0.0  ;;  %v47_v13 = vld [vmem:[%s1129_s2] sm:$0x3] }
   0xc   :  { %848 = vmatmul.mubr.msk.f32.vlgmr.msra.gmra.mrb[0].mxu0 %vm60_vm0, %v45_v10  ;;  %866 = vmatprep.subr.mxu1 %v932_v21  ;;  %v410_v41 = vsel %vm408_vm3, 1, %v936_v38  ;;  %v812_v31 = vld [vmem:[%s1130_s8] ss:$0 sm:$0xff] }
   0xd   :  { %863 = vmatprep.mubr.msk.f32.mxu0 %vm933_vm1, %v932_v21  ;;  %vm409_vm2 = vcmp.gt.f32.partialorder %v405_v35, 0.0  ;;  %v415_v42 = vrot.slane %v410_v41, %v414_v37 }
   0xe   :  { %v411_v39 = vsel %vm409_vm2, 1, %v936_v38 }
   0xf   :  { %v419_v40 = vrot.slane %v411_v39, %v414_v37  ;;  %vm420_vm6 = vcmp.eq.s32.totalorder %v415_v42, 1 }
  0x11   :  { %vm421_vm4 = vcmp.eq.s32.totalorder %v419_v40, 1 }
  0xdf   :  { %v849_v15 = vpop.f32.mrb[0].mxu0 }
  0xe0   :  { %v1044_v16 = vadd.f32 %v849_v15, %v801_v14  ;;  %v133_v17 = vpop.f32.mrb[1].mxu0 }
  0xe1   :  { %v1046_v18 = vadd.f32 %v801_v14, %v133_v17 }
  0xe2   :  { %v143_v20 = vmax.f32 %v1044_v16, 0.0 }
  0xe3   :  { %v142_v19 = vmax.f32 %v1046_v18, 0.0  ;;  %v815_v18 = vld [vmem:[%s1131_s10] ss:$0 sm:$0xff] }
  0xe5   :  { %858 = vmatprep.mubr.msk.f32.mxu1 %vm60_vm0, %v142_v19 }
  0xe6   :  { %859 = vmatmul.mubr.msk.f32.vlgmr.msra.gmra.mrb[0].mxu1 %vm60_vm0, %v143_v20 }
  0xe7   :  { %868 = vmatprep.mubr.msk.f32.mxu1 %vm933_vm1, %v932_v21 }
 0x1b9   :  { %v860_v22 = vpop.f32.mrb[0].mxu1 }
 0x1ba   :  { %307 = vrot.lane.b32.xlu0 %v860_v22, %s934_s0  ;;  %v220_v23 = vpop.f32.mrb[1].mxu1 }
 0x1be   :  { %230 = vrot.lane.b32.xlu0 %v220_v23, %s934_s0 }
 0x22c   :  { %v308_v24 = vpop.permute.xlu0 %307 }
 0x22d   :  { %867 = vmatpush3.xpose.msk.msra.mxu1 %vm60_vm0, %v308_v24 }
 0x22e   :  { %876 = vmatprep.subr.mxu1 %v932_v21 }
 0x230   :  { %869 = vmatmul.mubr.msk.f32.vlgmr.msra.gmra.mrb[2].mxu1 %vm60_vm0, %v860_v22  ;;  %v231_v25 = vpop.permute.xlu0 %230 }
 0x231   :  { %862 = vmatpush3.xpose.msk.msra.mxu0 %vm60_vm0, %v231_v25  ;;  %878 = vmatprep.mubr.msk.f32.mxu1 %vm933_vm1, %v932_v21 }
 0x232   :  { %871 = vmatprep.subr.mxu0 %v932_v21 }
 0x234   :  { %864 = vmatmul.mubr.msk.f32.vlgmr.msra.gmra.mrb[2].mxu0 %vm60_vm0, %v220_v23 }
 0x235   :  { %873 = vmatprep.mubr.msk.f32.mxu0 %vm933_vm1, %v932_v21 }
 0x303   :  { %v379_v43 = vpop.f32.mrb[2].mxu1 }
 0x304   :  { %v423_v44 = vsel %vm421_vm4, %v379_v43, -1e+30  ;;  %v870_v45 = vpop.f32.mrb[3].mxu1 }
 0x305   :  { %v428_v46 = vsel %vm424_vm5, %v423_v44, -inf }
 0x306   :  { %429 = vmax.xlane.f32.xlu1 %v428_v46 }
 0x307   :  { %v302_v47 = vpop.f32.mrb[2].mxu0 }
 0x308   :  { %v422_v48 = vsel %vm420_vm6, %v302_v47, -1e+30  ;;  %v865_v49 = vpop.f32.mrb[3].mxu0 }
 0x309   :  { %v425_v50 = vsel %vm424_vm5, %v422_v48, -inf }
 0x30a   :  { %426 = vmax.xlane.f32.xlu1 %v425_v50 }
 0x31b   :  { %523 = vrot.lane.b32.xlu1 %v860_v22, %s937_s1 }
 0x393   :  { %v430_v51 = vpop.xlane.xlu1 %429 }
 0x394   :  { %v432_v52 = vsub.f32 %v423_v44, %v430_v51 }
 0x396   :  { %v435_v53 = vmul.f32 1.442695, %v432_v52 }
 0x397   :  { %v427_v54 = vpop.xlane.xlu1 %426 }
 0x398   :  { %914 = vpow2.f32 %v435_v53  ;;  %v431_v55 = vsub.f32 %v422_v48, %v427_v54  ;;  %v814_v48 = vld [vmem:[%s1132_s9] ss:$0 sm:$0xff] }
 0x39a   :  { %v433_v56 = vmul.f32 1.442695, %v431_v55 }
 0x39b   :  { %v524_v57 = vpop.permute.xlu1 %523 }
 0x39c   :  { %916 = vpow2.f32 %v433_v56  ;;  %877 = vmatpush3.msra.mxu1 %v524_v57 }
 0x3a2   :  { %v915_v58 = vpop.eup %914 }
 0x3a3   :  { %v440_v59 = vsel %vm424_vm5, %v915_v58, 0.0 }
 0x3a4   :  { %441 = vadd.xlane.f32.xlu0 %v440_v59  ;;  %v759_v59 = vstv %s1133_s11 }
 0x3a6   :  { %v917_v60 = vpop.eup %916 }
 0x3a7   :  { %v437_v61 = vsel %vm424_vm5, %v917_v60, 0.0 }
 0x3a8   :  { %438 = vadd.xlane.f32.xlu1 %v437_v61 }
 0x3b9   :  { %447 = vrot.lane.b32.xlu1 %v220_v23, %s937_s1 }
 0x3ba   :  { %618 = vbcast.lane.b32.xlu0 %v616_v63, 256 }
 0x3be   :  { %611 = vbcast.lane.b32.xlu0 %v609_v0, 256 }
 0x3dd   :  { %603 = vadd.xlane.f32.xlu1 %v602_v1 }
 0x431   :  { %v442_v2 = vpop.xlane.xlu0 %441 }
 0x432   :  { %918 = vrcp.f32 %v442_v2 }
 0x435   :  { %v439_v3 = vpop.xlane.xlu1 %438  ;;  %v619_v17 = vpop.permute.xlu0 %618 }
 0x436   :  { %920 = vrcp.f32 %v439_v3 }
 0x439   :  { %v448_v4 = vpop.permute.xlu1 %447  ;;  %v612_v27 = vpop.permute.xlu0 %611 }
 0x43a   :  { %872 = vmatpush3.msra.mxu0 %v448_v4 }
 0x43b   :  { %904 = vmatprep.subr.bf16.mxu0 %v938_v5 }
 0x43c   :  { %v919_v6 = vpop.eup %918 }
 0x43d   :  { %v446_v7 = vmul.f32 %v919_v6, %v915_v58 }
 0x43f   :  { %879 = vmatmul.mubr.msk.f32.vlgmr.msra.gmra.mrb[4].mxu1 %vm424_vm5, %v446_v7  ;;  %v48_v7 = vld [vmem:[%s1135_s3] sm:$0x3] }
 0x440   :  { %v921_v10 = vpop.eup %920  ;;  %v785_v9 = vsub.f32 1.0, %v48_v7 }
 0x441   :  { %v445_v12 = vmul.f32 %v921_v10, %v917_v60 }
 0x442   :  { %v786_v10 = vmul.f32 0.2, %v785_v9 }
 0x443   :  { %874 = vmatmul.mubr.msk.f32.vlgmr.msra.gmra.mrb[4].mxu0 %vm424_vm5, %v445_v12 }
 0x444   :  { %906 = vmatpush3.bf16.msra.mxu0 %v905_v11  ;;  %885 = vmatprep.mubr.msk.f32.mxu0 %vm933_vm1, %v932_v21  ;;  %v780_v11 = vmul.f32 0.8, %v48_v7 }
 0x447   :  { %886 = vmatmul.mubr.msk.f32.vlgmr.msra.gmra.mrb[6].mxu0 %vm652_vm8, %v47_v13 }
 0x46a   :  { %v604_v14 = vpop.xlane.xlu1 %603 }
 0x46b   :  { %v605_v15 = vadd.f32 1e-06, %v604_v14 }
 0x46d   :  { %922 = vrcp.f32 %v605_v15 }
 0x512   :  { %v595_v22 = vpop.f32.mrb[4].mxu1 }
 0x513   :  { %v600_v23 = vadd.f32 %v595_v22, %v143_v20  ;;  %v880_v24 = vpop.f32.mrb[5].mxu1 }
 0x515   :  { %v621_v25 = vmul.f32 %v619_v17, %v600_v23 }
 0x516   :  { %v519_v26 = vpop.f32.mrb[4].mxu0 }
 0x517   :  { %v629_v21 = vsel %vm60_vm0, %v621_v25, 0.0  ;;  %v599_v28 = vadd.f32 %v519_v26, %v142_v19  ;;  %v875_v29 = vpop.f32.mrb[5].mxu0  ;;  %v923_v19 = vpop.eup %922 }
 0x518   :  { %v630_v30 = vrot.slane %v629_v21, 4  ;;  %v638_v44 = vrot.slane %v923_v19, 1 }
 0x519   :  { %v620_v32 = vmul.f32 %v612_v27, %v599_v28 }
 0x51a   :  { %v631_v33 = vadd.f32 %v630_v30, %v629_v21  ;;  %v722_v16 = vpop.f32.mrb[6].mxu0 }
 0x51b   :  { %v622_v20 = vsel %vm60_vm0, %v620_v32, 0.0  ;;  %v723_v34 = vadd.f32 %v812_v31, %v722_v16  ;;  %v887_v35 = vpop.f32.mrb[7].mxu0 }
 0x51c   :  { %v632_v36 = vrot.slane %v631_v33, 2  ;;  %v623_v37 = vrot.slane %v622_v20, 4 }
 0x51d   :  { %v726_v38 = vmax.f32 %v723_v34, 0.0 }
 0x51e   :  { %v633_v39 = vadd.f32 %v632_v36, %v631_v33  ;;  %v624_v40 = vadd.f32 %v623_v37, %v622_v20 }
 0x51f   :  { %v753_v41 = vmul.f32 %v815_v18, %v726_v38 }
 0x520   :  { %v634_v42 = vrot.slane %v633_v39, 1  ;;  %v625_v43 = vrot.slane %v624_v40, 2 }
 0x521   :  { %v754_v45 = vsel %vm742_vm9, %v753_v41, 0.0 }
 0x522   :  { %v635_v46 = vadd.f32 %v634_v42, %v633_v39  ;;  %v626_v47 = vadd.f32 %v625_v43, %v624_v40  ;;  %755 = vadd.xlane.f32.xlu1 %v754_v45 }
 0x524   :  { %v627_v49 = vrot.slane %v626_v47, 1  ;;  %v642_v50 = vmul.f32 %v638_v44, %v635_v46 }
 0x526   :  { %v628_v51 = vadd.f32 %v627_v49, %v626_v47  ;;  %v735_v52 = vmul.f32 %v814_v48, %v642_v50 }
 0x528   :  { %v641_v53 = vmul.f32 %v923_v19, %v628_v51  ;;  %v738_v55 = vrot.slane %v735_v52, 7 }
 0x52a   :  { %v734_v54 = vmul.f32 %v814_v48, %v641_v53 }
 0x52c   :  { %v740_v56 = vsel %vm739_vm10, %v738_v55, %v734_v54 }
 0x52d   :  { %v743_v57 = vsel %vm742_vm9, %v740_v56, 0.0 }
 0x52e   :  { %744 = vadd.xlane.f32.xlu0 %v743_v57 }
 0x5af   :  { %v756_v58 = vpop.xlane.xlu1 %755 }
 0x5bb   :  { %v745_v60 = vpop.xlane.xlu0 %744 }
 0x5bc   :  { %v757_v61 = vadd.f32 %v756_v58, %v745_v60 }
 0x5be   :  { %v760_v62 = vadd.f32 %v759_v59, %v757_v61 }
 0x5c0   :  { %762 = vst.msk [vmem:[%s1134_s12] sm:$0x3] %vm761_vm11, %v760_v62  ;;  %v763_v63 = vsub.f32 0.0, %v760_v62  ;;  %v768_v0 = vand.u32 2147483647, %v760_v62  ;;  %v777_v22 = vmax.f32 %v760_v62, 0.0 }
 0x5c2   :  { %v764_v1 = vmul.f32 1.442695, %v763_v63  ;;  %v769_v2 = vsub.f32 0.0, %v768_v0  ;;  %v775_v25 = vmax.f32 %v763_v63, 0.0 }
 0x5c4   :  { %924 = vpow2.f32 %v764_v1  ;;  %v770_v3 = vmul.f32 1.442695, %v769_v2 }
 0x5c6   :  { %926 = vpow2.f32 %v770_v3 }
 0x5ce   :  { %v925_v4 = vpop.eup %924 }
 0x5cf   :  { %v766_v5 = vadd.f32 1.0, %v925_v4 }
 0x5d0   :  { %v927_v6 = vpop.eup %926 }
 0x5d1   :  { %928 = vrcp.f32 %v766_v5  ;;  %v772_v8 = vadd.f32 1.0, %v927_v6 }
 0x5d3   :  { %930 = vlog2.f32 %v772_v8 }
 0x5db   :  { %v929_v12 = vpop.eup %928 }
 0x5dc   :  { %v779_v13 = vsub.f32 1.0, %v929_v12  ;;  %v787_v14 = vmul.f32 %v929_v12, %v786_v10 }
 0x5dd   :  { %v931_v15 = vpop.eup %930 }
 0x5de   :  { %v774_v17 = vmul.f32 0.6931472, %v931_v15  ;;  %v781_v23 = vmul.f32 %v780_v11, %v779_v13  ;;  %v788_v24 = vmul.f32 %v929_v12, %v787_v14 }
 0x5e0   :  { %v778_v26 = vadd.f32 %v777_v22, %v774_v17  ;;  %v782_v27 = vmul.f32 %v781_v23, %v779_v13  ;;  %v789_v21 = vmul.f32 %v929_v12, %v788_v24  ;;  %v776_v28 = vadd.f32 %v775_v25, %v774_v17 }
 0x5e2   :  { %v783_v29 = vmul.f32 %v782_v27, %v779_v13  ;;  %v790_v31 = vmul.f32 %v789_v21, %v778_v26 }
 0x5e4   :  { %v784_v30 = vmul.f32 %v783_v29, %v776_v28 }
 0x5e6   :  { %v791_v32 = vadd.f32 %v790_v31, %v784_v30 }
 0x5e8   :  { %792 = vst.msk [vmem:[%s1136_s13] sm:$0x3] %vm761_vm11, %v791_v32 }

</bundles_post_ra>
